<compile_context>
chip_gen: v7x
topology: tpu7x:2x2x1
jax: 0.10.0
libtpu: 0.0.40
codegen_flags: <defaults>
</compile_context>

<pallas_src>
import functools

import jax
import jax.numpy as jnp
from jax.experimental import pallas as pl
from jax.experimental.pallas import tpu as pltpu


def _round_up(x: int, m: int) -> int:
    return ((x + m - 1) // m) * m


def mlp_kernel(x_ref, w1_ref, b1_ref, w2_ref, b2_ref, o_ref):
    # x_ref : (4, TB)  VMEM  -- features on sublanes, batch on lanes (lane-dense)
    # w1_ref: (4, 4)   SMEM  -- stored (in, out), matches x @ W1
    # b1_ref: (1, 4)   SMEM
    # w2_ref: (4, 2)   SMEM
    # b2_ref: (1, 2)   SMEM
    # o_ref : (2, TB)  VMEM
    x = x_ref[...]  # (4, TB) f32

    # Hoist all SMEM scalars once (cheap sld; reused across the FMAs below).
    w1 = [[w1_ref[k, j] for j in range(4)] for k in range(4)]
    b1 = [b1_ref[0, j] for j in range(4)]
    w2 = [[w2_ref[k, j] for j in range(2)] for k in range(4)]
    b2 = [b2_ref[0, j] for j in range(2)]

    # ---- Layer 1 + ReLU: h_j = relu(sum_k w1[k][j] * x_k + b1[j]) ----
    # Fully unrolled VPU broadcast-FMAs on (1, TB) lane-dense rows; no MXU.
    h = []
    for j in range(4):
        acc = b1[j] + w1[0][j] * x[0:1, :]
        for k in range(1, 4):
            acc = acc + w1[k][j] * x[k:k + 1, :]
        h.append(jnp.maximum(acc, 0.0))  # (1, TB)

    # ---- Layer 2: y_j = sum_k w2[k][j] * h_k + b2[j] ----
    for j in range(2):
        acc = b2[j] + w2[0][j] * h[0]
        for k in range(1, 4):
            acc = acc + w2[k][j] * h[k]
        o_ref[j:j + 1, :] = acc  # full-width lane-dense store (unmasked vst)


@functools.partial(jax.jit, static_argnames=("tile_b",))
def neural_network_forward(x, w1, b1, w2, b2, *, tile_b: int = 1024):
    """x: (B, 4) f32 -> (B, 2) f32.  Weights stored (in, out); biases (out,)."""
    B, f_in = x.shape
    assert f_in == 4, "NeuralNetwork expects 4 input features"

    # Lane-dense layout: transpose so batch runs along the 128-wide lane axis.
    xt = jnp.asarray(x, jnp.float32).T  # (4, B)

    # Lane tile must be a multiple of 128; clamp for small batches.
    tb = min(int(tile_b), _round_up(B, 128))
    tb = _round_up(tb, 128)
    b_padded = _round_up(B, tb)
    if b_padded != B:
        xt = jnp.pad(xt, ((0, 0), (0, b_padded - B)))

    w1 = jnp.asarray(w1, jnp.float32)                  # (4, 4)
    w2 = jnp.asarray(w2, jnp.float32)                  # (4, 2)
    b1_2d = jnp.asarray(b1, jnp.float32).reshape(1, 4)
    b2_2d = jnp.asarray(b2, jnp.float32).reshape(1, 2)

    smem = pl.BlockSpec(memory_space=pltpu.MemorySpace.SMEM)
    grid = (b_padded // tb,)

    out_t = pl.pallas_call(
        mlp_kernel,
        out_shape=jax.ShapeDtypeStruct((2, b_padded), jnp.float32),
        grid=grid,
        in_specs=[
            pl.BlockSpec((4, tb), lambda i: (0, i)),  # activations, pipelined
            smem,  # w1 (resident, no per-step DMA)
            smem,  # b1
            smem,  # w2
            smem,  # b2
        ],
        out_specs=pl.BlockSpec((2, tb), lambda i: (0, i)),
        compiler_params=pltpu.CompilerParams(
            dimension_semantics=("parallel",),  # shard batch grid across TCs (v7x)
        ),
    )(xt, w1, b1_2d, w2, b2_2d)

    return out_t[:, :B].T  # (B, 2)


def init_params(key):
    """Deterministic init mirroring nn.Linear shapes (weights stored (in, out))."""
    k1, k2, k3, k4 = jax.random.split(key, 4)
    w1 = jax.random.uniform(k1, (4, 4), jnp.float32, -0.5, 0.5)  # Linear(4, 4)
    b1 = jax.random.uniform(k2, (4,), jnp.float32, -0.5, 0.5)
    w2 = jax.random.uniform(k3, (4, 2), jnp.float32, -0.5, 0.5)  # Linear(4, 2)
    b2 = jax.random.uniform(k4, (2,), jnp.float32, -0.5, 0.5)
    return w1, b1, w2, b2


def reference_forward(x, w1, b1, w2, b2):
    h = jnp.maximum(x @ w1 + b1[None, :], 0.0)
    return h @ w2 + b2[None, :]


if __name__ == "__main__":
    key = jax.random.PRNGKey(0)
    kx, kp = jax.random.split(key)

    # B=300 is deliberately NOT a multiple of the tile so the pad + multi-step
    # grid path is exercised (tile_b=128 -> 3 grid steps).
    B = 300
    x = jax.random.normal(kx, (B, 4), jnp.float32)
    w1, b1, w2, b2 = init_params(kp)

    out = neural_network_forward(x, w1, b1, w2, b2, tile_b=128)
    out = jax.block_until_ready(out)

    ref = reference_forward(x, w1, b1, w2, b2)
    assert out.shape == (B, 2)
    assert jnp.allclose(out, ref, atol=1e-5, rtol=1e-5), "mismatch vs reference"

    print("KERNEL_OK")
</pallas_src>

<mosaic_0001>
module attributes {stable_mosaic.version = 11 : i64} {
  func.func @mlp_kernel(%arg0: i32, %arg1: memref<4x128xf32, #tpu.memory_space<vmem>>, %arg2: memref<4x4xf32, #tpu.memory_space<smem>>, %arg3: memref<1x4xf32, #tpu.memory_space<smem>>, %arg4: memref<4x2xf32, #tpu.memory_space<smem>>, %arg5: memref<1x2xf32, #tpu.memory_space<smem>>, %arg6: memref<2x128xf32, #tpu.memory_space<vmem>>) attributes {dimension_semantics = [#tpu.dimension_semantics<parallel>], iteration_bounds = array<i64: 3>, scalar_prefetch = 0 : i64, scratch_operands = 0 : i64, tpu.core_type = #tpu.core_type<tc>, window_params = [{transform_indices = @transform_0, window_bounds = array<i64: 4, 128>}, {transform_indices = @transform_1, window_bounds = array<i64: 4, 4>}, {transform_indices = @transform_2, window_bounds = array<i64: 1, 4>}, {transform_indices = @transform_3, window_bounds = array<i64: 4, 2>}, {transform_indices = @transform_4, window_bounds = array<i64: 1, 2>}, {transform_indices = @transform_5, window_bounds = array<i64: 2, 128>}]} {
    %c0 = arith.constant 0 : index
    %c0_0 = arith.constant 0 : index
    %0 = vector.load %arg1[%c0, %c0_0] : memref<4x128xf32, #tpu.memory_space<vmem>>, vector<4x128xf32>
    %c0_1 = arith.constant 0 : index
    %c0_2 = arith.constant 0 : index
    %1 = memref.load %arg2[%c0_1, %c0_2] : memref<4x4xf32, #tpu.memory_space<smem>>
    %c0_3 = arith.constant 0 : index
    %c1 = arith.constant 1 : index
    %2 = memref.load %arg2[%c0_3, %c1] : memref<4x4xf32, #tpu.memory_space<smem>>
    %c0_4 = arith.constant 0 : index
    %c2 = arith.constant 2 : index
    %3 = memref.load %arg2[%c0_4, %c2] : memref<4x4xf32, #tpu.memory_space<smem>>
    %c0_5 = arith.constant 0 : index
    %c3 = arith.constant 3 : index
    %4 = memref.load %arg2[%c0_5, %c3] : memref<4x4xf32, #tpu.memory_space<smem>>
    %c1_6 = arith.constant 1 : index
    %c0_7 = arith.constant 0 : index
    %5 = memref.load %arg2[%c1_6, %c0_7] : memref<4x4xf32, #tpu.memory_space<smem>>
    %c1_8 = arith.constant 1 : index
    %c1_9 = arith.constant 1 : index
    %6 = memref.load %arg2[%c1_8, %c1_9] : memref<4x4xf32, #tpu.memory_space<smem>>
    %c1_10 = arith.constant 1 : index
    %c2_11 = arith.constant 2 : index
    %7 = memref.load %arg2[%c1_10, %c2_11] : memref<4x4xf32, #tpu.memory_space<smem>>
    %c1_12 = arith.constant 1 : index
    %c3_13 = arith.constant 3 : index
    %8 = memref.load %arg2[%c1_12, %c3_13] : memref<4x4xf32, #tpu.memory_space<smem>>
    %c2_14 = arith.constant 2 : index
    %c0_15 = arith.constant 0 : index
    %9 = memref.load %arg2[%c2_14, %c0_15] : memref<4x4xf32, #tpu.memory_space<smem>>
    %c2_16 = arith.constant 2 : index
    %c1_17 = arith.constant 1 : index
    %10 = memref.load %arg2[%c2_16, %c1_17] : memref<4x4xf32, #tpu.memory_space<smem>>
    %c2_18 = arith.constant 2 : index
    %c2_19 = arith.constant 2 : index
    %11 = memref.load %arg2[%c2_18, %c2_19] : memref<4x4xf32, #tpu.memory_space<smem>>
    %c2_20 = arith.constant 2 : index
    %c3_21 = arith.constant 3 : index
    %12 = memref.load %arg2[%c2_20, %c3_21] : memref<4x4xf32, #tpu.memory_space<smem>>
    %c3_22 = arith.constant 3 : index
    %c0_23 = arith.constant 0 : index
    %13 = memref.load %arg2[%c3_22, %c0_23] : memref<4x4xf32, #tpu.memory_space<smem>>
    %c3_24 = arith.constant 3 : index
    %c1_25 = arith.constant 1 : index
    %14 = memref.load %arg2[%c3_24, %c1_25] : memref<4x4xf32, #tpu.memory_space<smem>>
    %c3_26 = arith.constant 3 : index
    %c2_27 = arith.constant 2 : index
    %15 = memref.load %arg2[%c3_26, %c2_27] : memref<4x4xf32, #tpu.memory_space<smem>>
    %c3_28 = arith.constant 3 : index
    %c3_29 = arith.constant 3 : index
    %16 = memref.load %arg2[%c3_28, %c3_29] : memref<4x4xf32, #tpu.memory_space<smem>>
    %c0_30 = arith.constant 0 : index
    %c0_31 = arith.constant 0 : index
    %17 = memref.load %arg3[%c0_30, %c0_31] : memref<1x4xf32, #tpu.memory_space<smem>>
    %c0_32 = arith.constant 0 : index
    %c1_33 = arith.constant 1 : index
    %18 = memref.load %arg3[%c0_32, %c1_33] : memref<1x4xf32, #tpu.memory_space<smem>>
    %c0_34 = arith.constant 0 : index
    %c2_35 = arith.constant 2 : index
    %19 = memref.load %arg3[%c0_34, %c2_35] : memref<1x4xf32, #tpu.memory_space<smem>>
    %c0_36 = arith.constant 0 : index
    %c3_37 = arith.constant 3 : index
    %20 = memref.load %arg3[%c0_36, %c3_37] : memref<1x4xf32, #tpu.memory_space<smem>>
    %c0_38 = arith.constant 0 : index
    %c0_39 = arith.constant 0 : index
    %21 = memref.load %arg4[%c0_38, %c0_39] : memref<4x2xf32, #tpu.memory_space<smem>>
    %c0_40 = arith.constant 0 : index
    %c1_41 = arith.constant 1 : index
    %22 = memref.load %arg4[%c0_40, %c1_41] : memref<4x2xf32, #tpu.memory_space<smem>>
    %c1_42 = arith.constant 1 : index
    %c0_43 = arith.constant 0 : index
    %23 = memref.load %arg4[%c1_42, %c0_43] : memref<4x2xf32, #tpu.memory_space<smem>>
    %c1_44 = arith.constant 1 : index
    %c1_45 = arith.constant 1 : index
    %24 = memref.load %arg4[%c1_44, %c1_45] : memref<4x2xf32, #tpu.memory_space<smem>>
    %c2_46 = arith.constant 2 : index
    %c0_47 = arith.constant 0 : index
    %25 = memref.load %arg4[%c2_46, %c0_47] : memref<4x2xf32, #tpu.memory_space<smem>>
    %c2_48 = arith.constant 2 : index
    %c1_49 = arith.constant 1 : index
    %26 = memref.load %arg4[%c2_48, %c1_49] : memref<4x2xf32, #tpu.memory_space<smem>>
    %c3_50 = arith.constant 3 : index
    %c0_51 = arith.constant 0 : index
    %27 = memref.load %arg4[%c3_50, %c0_51] : memref<4x2xf32, #tpu.memory_space<smem>>
    %c3_52 = arith.constant 3 : index
    %c1_53 = arith.constant 1 : index
    %28 = memref.load %arg4[%c3_52, %c1_53] : memref<4x2xf32, #tpu.memory_space<smem>>
    %c0_54 = arith.constant 0 : index
    %c0_55 = arith.constant 0 : index
    %29 = memref.load %arg5[%c0_54, %c0_55] : memref<1x2xf32, #tpu.memory_space<smem>>
    %c0_56 = arith.constant 0 : index
    %c1_57 = arith.constant 1 : index
    %30 = memref.load %arg5[%c0_56, %c1_57] : memref<1x2xf32, #tpu.memory_space<smem>>
    %31 = vector.extract_strided_slice %0 {offsets = [0, 0], sizes = [1, 128], strides = [1, 1]} : vector<4x128xf32> to vector<1x128xf32>
    %32 = vector.broadcast %1 : f32 to vector<1x128xf32>
    %33 = arith.mulf %32, %31 : vector<1x128xf32>
    %34 = vector.broadcast %17 : f32 to vector<1x128xf32>
    %35 = arith.addf %34, %33 : vector<1x128xf32>
    %36 = vector.extract_strided_slice %0 {offsets = [1, 0], sizes = [1, 128], strides = [1, 1]} : vector<4x128xf32> to vector<1x128xf32>
    %37 = vector.broadcast %5 : f32 to vector<1x128xf32>
    %38 = arith.mulf %37, %36 : vector<1x128xf32>
    %39 = arith.addf %35, %38 : vector<1x128xf32>
    %40 = vector.extract_strided_slice %0 {offsets = [2, 0], sizes = [1, 128], strides = [1, 1]} : vector<4x128xf32> to vector<1x128xf32>
    %41 = vector.broadcast %9 : f32 to vector<1x128xf32>
    %42 = arith.mulf %41, %40 : vector<1x128xf32>
    %43 = arith.addf %39, %42 : vector<1x128xf32>
    %44 = vector.extract_strided_slice %0 {offsets = [3, 0], sizes = [1, 128], strides = [1, 1]} : vector<4x128xf32> to vector<1x128xf32>
    %45 = vector.broadcast %13 : f32 to vector<1x128xf32>
    %46 = arith.mulf %45, %44 : vector<1x128xf32>
    %47 = arith.addf %43, %46 : vector<1x128xf32>
    %cst = arith.constant 0.000000e+00 : f32
    %48 = vector.broadcast %cst : f32 to vector<1x128xf32>
    %49 = arith.maximumf %47, %48 : vector<1x128xf32>
    %50 = vector.extract_strided_slice %0 {offsets = [0, 0], sizes = [1, 128], strides = [1, 1]} : vector<4x128xf32> to vector<1x128xf32>
    %51 = vector.broadcast %2 : f32 to vector<1x128xf32>
    %52 = arith.mulf %51, %50 : vector<1x128xf32>
    %53 = vector.broadcast %18 : f32 to vector<1x128xf32>
    %54 = arith.addf %53, %52 : vector<1x128xf32>
    %55 = vector.extract_strided_slice %0 {offsets = [1, 0], sizes = [1, 128], strides = [1, 1]} : vector<4x128xf32> to vector<1x128xf32>
    %56 = vector.broadcast %6 : f32 to vector<1x128xf32>
    %57 = arith.mulf %56, %55 : vector<1x128xf32>
    %58 = arith.addf %54, %57 : vector<1x128xf32>
    %59 = vector.extract_strided_slice %0 {offsets = [2, 0], sizes = [1, 128], strides = [1, 1]} : vector<4x128xf32> to vector<1x128xf32>
    %60 = vector.broadcast %10 : f32 to vector<1x128xf32>
    %61 = arith.mulf %60, %59 : vector<1x128xf32>
    %62 = arith.addf %58, %61 : vector<1x128xf32>
    %63 = vector.extract_strided_slice %0 {offsets = [3, 0], sizes = [1, 128], strides = [1, 1]} : vector<4x128xf32> to vector<1x128xf32>
    %64 = vector.broadcast %14 : f32 to vector<1x128xf32>
    %65 = arith.mulf %64, %63 : vector<1x128xf32>
    %66 = arith.addf %62, %65 : vector<1x128xf32>
    %cst_58 = arith.constant 0.000000e+00 : f32
    %67 = vector.broadcast %cst_58 : f32 to vector<1x128xf32>
    %68 = arith.maximumf %66, %67 : vector<1x128xf32>
    %69 = vector.extract_strided_slice %0 {offsets = [0, 0], sizes = [1, 128], strides = [1, 1]} : vector<4x128xf32> to vector<1x128xf32>
    %70 = vector.broadcast %3 : f32 to vector<1x128xf32>
    %71 = arith.mulf %70, %69 : vector<1x128xf32>
    %72 = vector.broadcast %19 : f32 to vector<1x128xf32>
    %73 = arith.addf %72, %71 : vector<1x128xf32>
    %74 = vector.extract_strided_slice %0 {offsets = [1, 0], sizes = [1, 128], strides = [1, 1]} : vector<4x128xf32> to vector<1x128xf32>
    %75 = vector.broadcast %7 : f32 to vector<1x128xf32>
    %76 = arith.mulf %75, %74 : vector<1x128xf32>
    %77 = arith.addf %73, %76 : vector<1x128xf32>
    %78 = vector.extract_strided_slice %0 {offsets = [2, 0], sizes = [1, 128], strides = [1, 1]} : vector<4x128xf32> to vector<1x128xf32>
    %79 = vector.broadcast %11 : f32 to vector<1x128xf32>
    %80 = arith.mulf %79, %78 : vector<1x128xf32>
    %81 = arith.addf %77, %80 : vector<1x128xf32>
    %82 = vector.extract_strided_slice %0 {offsets = [3, 0], sizes = [1, 128], strides = [1, 1]} : vector<4x128xf32> to vector<1x128xf32>
    %83 = vector.broadcast %15 : f32 to vector<1x128xf32>
    %84 = arith.mulf %83, %82 : vector<1x128xf32>
    %85 = arith.addf %81, %84 : vector<1x128xf32>
    %cst_59 = arith.constant 0.000000e+00 : f32
    %86 = vector.broadcast %cst_59 : f32 to vector<1x128xf32>
    %87 = arith.maximumf %85, %86 : vector<1x128xf32>
    %88 = vector.extract_strided_slice %0 {offsets = [0, 0], sizes = [1, 128], strides = [1, 1]} : vector<4x128xf32> to vector<1x128xf32>
    %89 = vector.broadcast %4 : f32 to vector<1x128xf32>
    %90 = arith.mulf %89, %88 : vector<1x128xf32>
    %91 = vector.broadcast %20 : f32 to vector<1x128xf32>
    %92 = arith.addf %91, %90 : vector<1x128xf32>
    %93 = vector.extract_strided_slice %0 {offsets = [1, 0], sizes = [1, 128], strides = [1, 1]} : vector<4x128xf32> to vector<1x128xf32>
    %94 = vector.broadcast %8 : f32 to vector<1x128xf32>
    %95 = arith.mulf %94, %93 : vector<1x128xf32>
    %96 = arith.addf %92, %95 : vector<1x128xf32>
    %97 = vector.extract_strided_slice %0 {offsets = [2, 0], sizes = [1, 128], strides = [1, 1]} : vector<4x128xf32> to vector<1x128xf32>
    %98 = vector.broadcast %12 : f32 to vector<1x128xf32>
    %99 = arith.mulf %98, %97 : vector<1x128xf32>
    %100 = arith.addf %96, %99 : vector<1x128xf32>
    %101 = vector.extract_strided_slice %0 {offsets = [3, 0], sizes = [1, 128], strides = [1, 1]} : vector<4x128xf32> to vector<1x128xf32>
    %102 = vector.broadcast %16 : f32 to vector<1x128xf32>
    %103 = arith.mulf %102, %101 : vector<1x128xf32>
    %104 = arith.addf %100, %103 : vector<1x128xf32>
    %cst_60 = arith.constant 0.000000e+00 : f32
    %105 = vector.broadcast %cst_60 : f32 to vector<1x128xf32>
    %106 = arith.maximumf %104, %105 : vector<1x128xf32>
    %107 = vector.broadcast %21 : f32 to vector<1x128xf32>
    %108 = arith.mulf %107, %49 : vector<1x128xf32>
    %109 = vector.broadcast %29 : f32 to vector<1x128xf32>
    %110 = arith.addf %109, %108 : vector<1x128xf32>
    %111 = vector.broadcast %23 : f32 to vector<1x128xf32>
    %112 = arith.mulf %111, %68 : vector<1x128xf32>
    %113 = arith.addf %110, %112 : vector<1x128xf32>
    %114 = vector.broadcast %25 : f32 to vector<1x128xf32>
    %115 = arith.mulf %114, %87 : vector<1x128xf32>
    %116 = arith.addf %113, %115 : vector<1x128xf32>
    %117 = vector.broadcast %27 : f32 to vector<1x128xf32>
    %118 = arith.mulf %117, %106 : vector<1x128xf32>
    %119 = arith.addf %116, %118 : vector<1x128xf32>
    %c0_61 = arith.constant 0 : index
    %c0_62 = arith.constant 0 : index
    %120 = vector.load %arg6[%c0_61, %c0_62] : memref<2x128xf32, #tpu.memory_space<vmem>>, vector<1x128xf32>
    tpu.vector_store %arg6[%c0_61, %c0_62], %119 {strides = array<i32>} : memref<2x128xf32, #tpu.memory_space<vmem>>, vector<1x128xf32>,
    %121 = vector.broadcast %22 : f32 to vector<1x128xf32>
    %122 = arith.mulf %121, %49 : vector<1x128xf32>
    %123 = vector.broadcast %30 : f32 to vector<1x128xf32>
    %124 = arith.addf %123, %122 : vector<1x128xf32>
    %125 = vector.broadcast %24 : f32 to vector<1x128xf32>
    %126 = arith.mulf %125, %68 : vector<1x128xf32>
    %127 = arith.addf %124, %126 : vector<1x128xf32>
    %128 = vector.broadcast %26 : f32 to vector<1x128xf32>
    %129 = arith.mulf %128, %87 : vector<1x128xf32>
    %130 = arith.addf %127, %129 : vector<1x128xf32>
    %131 = vector.broadcast %28 : f32 to vector<1x128xf32>
    %132 = arith.mulf %131, %106 : vector<1x128xf32>
    %133 = arith.addf %130, %132 : vector<1x128xf32>
    %c1_63 = arith.constant 1 : index
    %c0_64 = arith.constant 0 : index
    %134 = vector.load %arg6[%c1_63, %c0_64] : memref<2x128xf32, #tpu.memory_space<vmem>>, vector<1x128xf32>
    tpu.vector_store %arg6[%c1_63, %c0_64], %133 {strides = array<i32>} : memref<2x128xf32, #tpu.memory_space<vmem>>, vector<1x128xf32>,
    return
  }
  func.func @transform_0(%arg0: i32) -> (i32, i32) {
    %c0_i32 = arith.constant 0 : i32
    %c0_i32_0 = arith.constant 0 : i32
    return %c0_i32, %arg0 : i32, i32
  }
  func.func @transform_1(%arg0: i32) -> (i32, i32) {
    %c0_i32 = arith.constant 0 : i32
    %c0_i32_0 = arith.constant 0 : i32
    %c0_i32_1 = arith.constant 0 : i32
    return %c0_i32, %c0_i32_0 : i32, i32
  }
  func.func @transform_2(%arg0: i32) -> (i32, i32) {
    %c0_i32 = arith.constant 0 : i32
    %c0_i32_0 = arith.constant 0 : i32
    %c0_i32_1 = arith.constant 0 : i32
    return %c0_i32, %c0_i32_0 : i32, i32
  }
  func.func @transform_3(%arg0: i32) -> (i32, i32) {
    %c0_i32 = arith.constant 0 : i32
    %c0_i32_0 = arith.constant 0 : i32
    %c0_i32_1 = arith.constant 0 : i32
    return %c0_i32, %c0_i32_0 : i32, i32
  }
  func.func @transform_4(%arg0: i32) -> (i32, i32) {
    %c0_i32 = arith.constant 0 : i32
    %c0_i32_0 = arith.constant 0 : i32
    %c0_i32_1 = arith.constant 0 : i32
    return %c0_i32, %c0_i32_0 : i32, i32
  }
  func.func @transform_5(%arg0: i32) -> (i32, i32) {
    %c0_i32 = arith.constant 0 : i32
    %c0_i32_0 = arith.constant 0 : i32
    return %c0_i32, %arg0 : i32, i32
  }
}

</mosaic_0001>

<bundles_post_ra>
// kernel: neural_network_forward.1
= control target key start
LH: loop header
LB: loop body
LE: loop exit
PB: predicated region body
PF: predicated region fallthrough
CT: control target
= control target key end

     0   :  { %10 = vsyncpa [#allocation3], 0  ;;  %s914_s0 = inlined_call_operand.vmem [shape: f32[4,384], index: 0, kind: input, shape index: {}]   ;;  %s915_s1 = inlined_call_operand.vmem [shape: f32[4,4], index: 1, kind: input, shape index: {}]   ;;  %s916_s2 = inlined_call_operand.vmem [shape: f32[1,4], index: 2, kind: input, shape index: {}]   ;;  %s917_s3 = inlined_call_operand.vmem [shape: f32[4,2], index: 3, kind: input, shape index: {}]   ;;  %s918_s4 = inlined_call_operand.vmem [shape: f32[1,2], index: 4, kind: input, shape index: {}]   ;;  %s919_s5 = inlined_call_operand.vmem [shape: f32[2,384], index: 5, kind: output, shape index: {}]  }
   0x1   :  { %11 = vsyncpa [#allocation5], 0 }
   0x2   :  { %12 = vsyncpa [#allocation8], 0  ;;  %s723_s18 = smov 0  }
   0x3 LB: > { %s183_s21 = sshll.u32 %s916_s2, 4  ;;  %s732_s22 = sadd.s32 4294967295, %s687_s18   ;;  %s687_s18 = sphi %s723_s18, %s18_s18   ;;  %s184_s21 = int_to_ptr.vmem [resolvable:$true] %s183_s21 }
   0x4   : > { %p519_p0 = scmp.ge.s32.totalorder %s687_s18, 1  ;;  %p159_p1 = scmp.lt.s32.totalorder %s687_s18, 4 }
   0x5   : > { %p589_p2 = scmp.eq.s32.totalorder %s732_s22, 0  ;;  %s172_s26 = sshll.u32 %s915_s1, 4  ;;  %s744_s26 = int_to_ptr.vmem [resolvable:$true] %s172_s26 }
   0x6   : > { %p737_p3 = pnand %p519_p0, %p159_p1  ;;  %s194_s29 = sshll.u32 %s917_s3, 4  ;;  %s751_s29 = int_to_ptr.vmem [resolvable:$true] %s194_s29 }
   0x7   : > { %s205_s8 = sshll.u32 %s918_s4, 4  ;;  %s609_s9 = scalar_lea.vmem %s184_s21, 16  ;;  %s762_s8 = int_to_ptr.vmem [resolvable:$true] %s205_s8 }
   0x8   : > { %p576_p4 = pneg %p737_p3  ;;  %p610_p6 = scmp.ne.s32.totalorder %s184_s21, %s609_s9 }
   0x9   : > { %p617_p10 = scmp.lt.s32.totalorder %s184_s21, %s184_s21  ;;  %p618_p11 = scmp.lt.s32.totalorder %s609_s9, %s609_s9 }
   0xa   : > { %p755_p5 = pnand %p589_p2, %p576_p4 }
   0xb   : > { %p619_p12 = por %p618_p11, %p617_p10 }
   0xc   : > { %p611_p7 = pneg %p755_p5 }
   0xe   : > { %p612_p8 = pnand %p611_p7, %p610_p6 }
  0x10   : > { %p613_p9 = pneg %p612_p8 }
  0x12   : > { %p620_p13 = pnand %p619_p12, %p613_p9 }
  0x14   : > { %623 = shalt.err (!%p620_p13)
}
  0x15   : > { %s689_s10 = smov [#allocation4]   ;;  %s624_s11 = scalar_lea.vmem %s744_s26, 64 }
  0x16   : > { %582 = dma.vmem_to_smem (!%p755_p5), %s184_s21, 16, %s689_s10, [#allocation5]  }
  0x17   : > { %p625_p0 = scmp.ne.s32.totalorder %s744_s26, %s624_s11  ;;  %p632_p6 = scmp.lt.s32.totalorder %s744_s26, %s744_s26 }
  0x18   : > { %p633_p8 = scmp.lt.s32.totalorder %s624_s11, %s624_s11 }
  0x19   : > { %p627_p1 = pnand %p625_p0, %p611_p7 }
  0x1a   : > { %p634_p10 = por %p633_p8, %p632_p6 }
  0x1b   : > { %p628_p4 = pneg %p627_p1 }
  0x1d   : > { %p635_p9 = pnand %p634_p10, %p628_p4 }
  0x1f   : > { %638 = shalt.err (!%p635_p9)
}
  0x20   : > { %s690_s12 = smov [#allocation2]   ;;  %s639_s13 = scalar_lea.vmem %s751_s29, 64 }
  0x21   : > { %579 = dma.vmem_to_smem (!%p755_p5), %s744_s26, 64, %s690_s12, [#allocation3]  }
  0x22   : > { %p640_p11 = scmp.ne.s32.totalorder %s751_s29, %s639_s13  ;;  %p647_p0 = scmp.lt.s32.totalorder %s751_s29, %s751_s29 }
  0x23   : > { %p648_p1 = scmp.lt.s32.totalorder %s639_s13, %s639_s13 }
  0x24   : > { %p642_p12 = pnand %p640_p11, %p611_p7 }
  0x25   : > { %p649_p4 = por %p648_p1, %p647_p0 }
  0x26   : > { %p643_p13 = pneg %p642_p12 }
  0x28   : > { %p650_p6 = pnand %p649_p4, %p643_p13 }
  0x2a   : > { %653 = shalt.err (!%p650_p6)
}
  0x2b   : > { %s691_s14 = smov [#allocation6]   ;;  %s654_s15 = scalar_lea.vmem %s762_s8, 16 }
  0x2c   : > { %585 = dma.vmem_to_smem (!%p755_p5), %s751_s29, 64, %s691_s14, [#allocation5]  }
  0x2d   : > { %p655_p8 = scmp.ne.s32.totalorder %s762_s8, %s654_s15  ;;  %p662_p11 = scmp.lt.s32.totalorder %s762_s8, %s762_s8 }
  0x2e   : > { %p663_p12 = scmp.lt.s32.totalorder %s654_s15, %s654_s15 }
  0x2f   : > { %p657_p10 = pnand %p655_p8, %p611_p7 }
  0x30   : > { %p664_p13 = por %p663_p12, %p662_p11 }
  0x31   : > { %p658_p9 = pneg %p657_p10 }
  0x33   : > { %p665_p0 = pnand %p664_p13, %p658_p9 }
  0x35   : > { %668 = shalt.err (!%p665_p0)
}
  0x36   : > { %s692_s16 = smov [#allocation7]   ;;  %225 = sbr.rel (%p737_p3) target bundleno = 106 (0x6a), region = 40 }
  0x37   : > { %588 = dma.vmem_to_smem (!%p755_p5), %s762_s8, 16, %s692_s16, [#allocation8]  }
  0x3d   : > { %674 = dma.done.wait (%p589_p2), [#allocation3], 64  }
  0x3e   : > { %676 = vsyncadd (%p589_p2), [#allocation3], 4294967232 }
  0x3f   : > { %678 = dma.done.wait (%p589_p2), [#allocation5], 80  }
  0x40   : > { %680 = vsyncadd (%p589_p2), [#allocation5], 4294967216 }
  0x41   : > { %682 = dma.done.wait (%p589_p2), [#allocation8], 16  }
  0x42   : > { %684 = vsyncadd (%p589_p2), [#allocation8], 4294967280 }
  0x43   : > { %243 = sfence }
  0x44   : > { %p264_p3 = scmp.lt.s32.totalorder %s732_s22, 2  ;;  %s273_s17 = sld [smem:[#allocation2]] }
  0x45   : > { %s532_s19 = sld [smem:[#allocation2 + $0x1]]  ;;  %s533_s20 = sld [smem:[#allocation2 + $0x2]] }
  0x46   : > { %s923_s22 = smov (!%p264_p3, %s732_s22), 2  ;;  %s534_s21 = sld [smem:[#allocation2 + $0x3]] }
  0x47   : > { %s535_s23 = sld [smem:[#allocation2 + $0x80]]  ;;  %s530_s24 = sshll.u32 %s923_s22, 2 }
  0x48   : > { %s267_s27 = scalar_lea.vmem %s914_s0, %s530_s24  ;;  %s536_s28 = sld [smem:[#allocation2 + $0x81]] }
  0x49   : > { %s537_s29 = sld [smem:[#allocation2 + $0x82]]  ;;  %v823_v0 = vld [vmem:[%s267_s27] sm:$0xf]  ;;  %s825_s30 = sld [smem:[#allocation2 + $0x83]] }
  0x4a   : > { %s539_s6 = sld [smem:[#allocation2 + $0x100]]  ;;  %s827_s7 = sld [smem:[#allocation2 + $0x101]]  ;;  %v303_v1 = vstv %s273_s17 }
  0x4b   : > { %s829_s8 = sld [smem:[#allocation2 + $0x102]]  ;;  %v326_v2 = vstv %s532_s19  ;;  %v349_v3 = vstv %s533_s20  ;;  %s831_s9 = sld [smem:[#allocation2 + $0x180]]  ;;  %v304_v7 = vmul.f32 %v303_v1, %v823_v0 }
  0x4c   : > { %v372_v5 = vstv %s534_s21  ;;  %s833_s10 = sld [smem:[#allocation2 + $0x181]]  ;;  %s835_s11 = sld [smem:[#allocation2 + $0x182]]  ;;  %v327_v8 = vmul.f32 %v326_v2, %v823_v0  ;;  %v350_v9 = vmul.f32 %v349_v3, %v823_v0 }
  0x4d   : > { %v307_v4 = vstv %s535_s23  ;;  %s838_s12 = sld [smem:[#allocation4]]  ;;  %s843_s13 = sld [smem:[#allocation4 + $0x1]]  ;;  %v373_v13 = vmul.f32 %v372_v5, %v823_v0 }
  0x4e   : > { %v308_v6 = vmul.f32 %v307_v4, %v823_v0  ;;  %s845_s14 = sld [smem:[#allocation4 + $0x2]]  ;;  %v330_v11 = vstv %s536_s28  ;;  %s848_s15 = sld [smem:[#allocation2 + $0x103]] }
  0x4f   : > { %v353_v12 = vstv %s537_s29  ;;  %s850_s16 = sld [smem:[#allocation4 + $0x3]]  ;;  %v331_v15 = vmul.f32 %v330_v11, %v823_v0  ;;  %v376_v17 = vstv %s825_s30  ;;  %s863_s19 = sld [smem:[#allocation6]] }
  0x50   : > { %v310_v10 = vrot.slane %v308_v6, 1  ;;  %v313_v14 = vstv %s539_s6  ;;  %v354_v16 = vmul.f32 %v353_v12, %v823_v0  ;;  %s855_s17 = sld [smem:[#allocation2 + $0x183]]  ;;  %v336_v19 = vstv %s827_s7  ;;  %s868_s20 = sld [smem:[#allocation6 + $0x80]] }
  0x51   : > { %v314_v18 = vmul.f32 %v313_v14, %v823_v0  ;;  %v359_v20 = vstv %s829_s8  ;;  %v377_v21 = vmul.f32 %v376_v17, %v823_v0  ;;  %v319_v22 = vstv %s831_s9  ;;  %s870_s21 = sld [smem:[#allocation7]]  ;;  %s881_s25 = sld [smem:[#allocation6 + $0x1]] }
  0x52   : > { %v333_v23 = vrot.slane %v331_v15, 1  ;;  %v337_v24 = vmul.f32 %v336_v19, %v823_v0  ;;  %v356_v25 = vrot.slane %v354_v16, 1  ;;  %v320_v27 = vmul.f32 %v319_v22, %v823_v0  ;;  %s875_s23 = sld [smem:[#allocation6 + $0x100]]  ;;  %s883_s26 = sld [smem:[#allocation7 + $0x1]] }
  0x53   : > { %v316_v26 = vrot.slane %v314_v18, 2  ;;  %v342_v28 = vstv %s833_s10  ;;  %v360_v29 = vmul.f32 %v359_v20, %v823_v0  ;;  %v305_v30 = vstv %s838_s12  ;;  %s877_s24 = sld [smem:[#allocation6 + $0x180]]  ;;  %s885_s27 = sld [smem:[#allocation6 + $0x81]] }
  0x54   : > { %v339_v31 = vrot.slane %v337_v24, 2  ;;  %v343_v32 = vmul.f32 %v342_v28, %v823_v0  ;;  %v365_v33 = vstv %s835_s11  ;;  %v306_v34 = vadd.f32 %v305_v30, %v304_v7  ;;  %s889_s28 = sld [smem:[#allocation6 + $0x101]]  ;;  %s531_s30 = sshll.u32 %s923_s22, 1 }
  0x55   : > { %v322_v35 = vrot.slane %v320_v27, 3  ;;  %v328_v36 = vstv %s843_s13  ;;  %v351_v37 = vstv %s845_s14  ;;  %v362_v41 = vrot.slane %v360_v29, 2  ;;  %s894_s29 = sld [smem:[#allocation6 + $0x181]]  ;;  %s271_s8 = scalar_lea.vmem %s919_s5, %s531_s30 }
  0x56   : > { %v329_v38 = vadd.f32 %v328_v36, %v327_v8  ;;  %v345_v39 = vrot.slane %v343_v32, 3  ;;  %v352_v40 = vadd.f32 %v351_v37, %v350_v9  ;;  %v312_v42 = vadd.f32 %v310_v10, %v306_v34 }
  0x57   : > { %v366_v43 = vmul.f32 %v365_v33, %v823_v0  ;;  %v374_v44 = vstv %s850_s16  ;;  %v379_v45 = vrot.slane %v377_v21, 1  ;;  %v382_v49 = vstv %s848_s15 }
  0x58   : > { %v335_v46 = vadd.f32 %v333_v23, %v329_v38  ;;  %v358_v47 = vadd.f32 %v356_v25, %v352_v40  ;;  %v375_v48 = vadd.f32 %v374_v44, %v373_v13  ;;  %v318_v50 = vadd.f32 %v316_v26, %v312_v42 }
  0x59   : > { %v368_v51 = vrot.slane %v366_v43, 3  ;;  %v383_v52 = vmul.f32 %v382_v49, %v823_v0  ;;  %v388_v53 = vstv %s855_s17  ;;  %v395_v60 = vstv %s863_s19 }
  0x5a   : > { %v341_v54 = vadd.f32 %v339_v31, %v335_v46  ;;  %v364_v55 = vadd.f32 %v362_v41, %v358_v47  ;;  %v381_v56 = vadd.f32 %v379_v45, %v375_v48  ;;  %v389_v57 = vmul.f32 %v388_v53, %v823_v0 }
  0x5b   : > { %v324_v58 = vadd.f32 %v322_v35, %v318_v50  ;;  %v385_v59 = vrot.slane %v383_v52, 2  ;;  %v397_v61 = vstv %s870_s21  ;;  %v399_v2 = vstv %s868_s20 }
  0x5c   : > { %v347_v62 = vadd.f32 %v345_v39, %v341_v54  ;;  %v370_v63 = vadd.f32 %v368_v51, %v364_v55  ;;  %v391_v1 = vrot.slane %v389_v57, 3  ;;  %v402_v5 = vstv %s875_s23 }
  0x5d   : > { %v325_v3 = vmax.f32 %v324_v58, 0.0  ;;  %v387_v4 = vadd.f32 %v385_v59, %v381_v56  ;;  %v405_v6 = vstv %s877_s24  ;;  %v409_v0 = vstv %s881_s25 }
  0x5e   : > { %v348_v7 = vmax.f32 %v347_v62, 0.0  ;;  %v371_v8 = vmax.f32 %v370_v63, 0.0  ;;  %v411_v9 = vstv %s883_s26  ;;  %v413_v13 = vstv %s885_s27 }
  0x5f   : > { %v393_v10 = vadd.f32 %v391_v1, %v387_v4  ;;  %v396_v11 = vmul.f32 %v395_v60, %v325_v3  ;;  %v410_v12 = vmul.f32 %v409_v0, %v325_v3  ;;  %v416_v17 = vstv %s889_s28 }
  0x60   : > { %v400_v14 = vmul.f32 %v399_v2, %v348_v7  ;;  %v403_v15 = vmul.f32 %v402_v5, %v371_v8  ;;  %v414_v16 = vmul.f32 %v413_v13, %v348_v7  ;;  %v417_v21 = vmul.f32 %v416_v17, %v371_v8 }
  0x61   : > { %v394_v18 = vmax.f32 %v393_v10, 0.0  ;;  %v398_v19 = vadd.f32 %v397_v61, %v396_v11  ;;  %v412_v20 = vadd.f32 %v411_v9, %v410_v12  ;;  %v419_v22 = vstv %s894_s29 }
  0x63   : > { %v401_v23 = vadd.f32 %v400_v14, %v398_v19  ;;  %v406_v24 = vmul.f32 %v405_v6, %v394_v18  ;;  %v415_v25 = vadd.f32 %v414_v16, %v412_v20  ;;  %v420_v26 = vmul.f32 %v419_v22, %v394_v18 }
  0x65   : > { %v404_v27 = vadd.f32 %v403_v15, %v401_v23  ;;  %v418_v28 = vadd.f32 %v417_v21, %v415_v25 }
  0x67   : > { %v407_v29 = vadd.f32 %v406_v24, %v404_v27  ;;  %v421_v30 = vadd.f32 %v420_v26, %v418_v28 }
  0x69   : > { %408 = vst [vmem:[%s271_s8] sm:$0x1] %v407_v29  ;;  %422 = vst [vmem:[%s271_s8 + $0x1] sm:$0x1] %v421_v30 }
  0x6a PF: > { %s18_s18 = sadd.s32 1, %s687_s18  }
  0x6b   : > { %p15_p2 = scmp.ge.s32.totalorder %s18_s18, 5  }
  0x6d   :  { %17 = sbr.rel (!%p15_p2) target bundleno = 3 (0x3), region = 87 }
  0x74   :  { %442 = vsyncpa [#allocation3], 1 }
  0x75   :  { %444 = vsyncpa [#allocation3 + $0x1], 1 }
  0x76   :  { %445 = vsyncpa [#allocation5], 1 }
  0x77   :  { %446 = vsyncpa [#allocation8], 1 }

</bundles_post_ra>
